<compile_context>
chip_gen: v7x
topology: tpu7x:2x2x1
jax: 0.10.0
libtpu: 0.0.40
codegen_flags: <defaults>
</compile_context>

<pallas_src>
import jax
import jax.numpy as jnp
from jax.experimental import pallas as pl
from jax.experimental.pallas import tpu as pltpu


# ---------------------------------------------------------------------------
# Kernels
# ---------------------------------------------------------------------------

def _disentangle_fused_kernel(z_ref, w_ref, o_ref):
    """One (col-slice, batch) tile: single fused MXU matmul, f32 accumulation,
    lane-dense (>=128 wide) store into the fused (B, 2H) output."""
    o_ref[...] = jnp.dot(
        z_ref[...], w_ref[...], preferred_element_type=jnp.float32
    ).astype(o_ref.dtype)


def _disentangle_split_kernel(z_ref, w_ref, a_ref, s_ref):
    """One batch tile: single fused MXU matmul, outputs written directly to
    two lane-dense (tile_b, H) refs (no post-kernel slice copies)."""
    acc = jnp.dot(z_ref[...], w_ref[...], preferred_element_type=jnp.float32)
    h = a_ref.shape[-1]
    a_ref[...] = acc[:, :h].astype(a_ref.dtype)
    s_ref[...] = acc[:, h:].astype(s_ref.dtype)


# ---------------------------------------------------------------------------
# Generation-aware sizing helpers
# ---------------------------------------------------------------------------

def _round_up(x, m):
    return ((x + m - 1) // m) * m


def _tpu_info():
    """Best-effort (generation, per-core VMEM bytes). Never raises."""
    gen = 6
    try:
        kind = jax.devices()[0].device_kind.lower()
        for g in (7, 6, 5, 4):
            if f"v{g}" in kind:
                gen = g
                break
    except Exception:
        pass
    try:
        vmem_cap = int(pltpu.get_tpu_info().vmem_capacity_bytes)
    except Exception:
        vmem_cap = (64 << 20) if gen >= 7 else (128 << 20)
    return gen, vmem_cap


def _choose_tiles(B, D, two_h, *, gen, vmem_cap, w_bytes, o_bytes):
    """Pick (tile_b, tile_h) per chip generation.

    - Weight-slice single-buffer budget: ~12 MiB on v7x (64 MiB VMEM/TC),
      ~32 MiB on v5e/v6e (128 MiB VMEM).
    - Column-slice alignment prefers 256 (2x256^2 MXU) on v6e/v7x, 128 on v5e.
    - Batch tile is a multiple of 16 (bf16 sublane packing); only forced into
      >=2 grid steps on dual-TensorCore chips (v7x).
    - tile_b shrinks until the double-buffered z/weight/output working set
      fits ~60% of VMEM.
    """
    num_tc = 2 if gen >= 7 else 1
    w_budget = (12 << 20) if gen >= 7 else (32 << 20)
    n_align = 128 if gen <= 5 else 256

    # ---- output-column tile (weight slice) ----
    tile_h = two_h
    if D * two_h * w_bytes > w_budget:
        def try_split(align):
            th = two_h
            while (th % 2 == 0 and (th // 2) % align == 0
                   and D * th * w_bytes > w_budget):
                th //= 2
            return th
        if two_h % n_align == 0:
            tile_h = try_split(n_align)
        if D * tile_h * w_bytes > w_budget and two_h % 128 == 0:
            tile_h = min(tile_h, try_split(128))
        # TODO(synk): if 2H is both huge and not a multiple of 128, pad the
        # fused weight to a 128-aligned width instead of keeping it whole.

    # ---- batch tile ----
    max_tile = 512 if gen >= 7 else 1024
    tile_b = min(_round_up(max(B, 16), 16), max_tile)
    if num_tc >= 2 and B > 16:
        # Keep >= 2 batch grid steps so both v7x TensorCores get work.
        tile_b = min(tile_b, _round_up(pl.cdiv(B, 2), 16))

    budget = int(0.6 * vmem_cap)

    def footprint(tb):  # double-buffered z tile + weight slice + output tile
        return 2 * ((tb * D + D * tile_h) * w_bytes + tb * tile_h * o_bytes)

    while tile_b > 16 and footprint(tile_b) > budget:
        tile_b = max(16, _round_up(tile_b // 2, 16))
    # TODO(synk): for very large D, add a K-axis grid with an f32 VMEM
    # accumulator instead of only shrinking tile_b.
    return tile_b, tile_h


# ---------------------------------------------------------------------------
# Parameter fusion (call once, outside the hot path)
# ---------------------------------------------------------------------------

def prepare_fused_weight(w_act, w_sp, compute_dtype=jnp.bfloat16):
    """Fuse the two PyTorch-style (H, D) weights into one (D, 2H) matrix.

    Call ONCE at parameter-init time so the forward never pays a
    transpose/concat/cast over the weights.
    Columns [:H] -> act_embed projection, [H:] -> sp_embed projection.
    """
    w = jnp.concatenate([w_act, w_sp], axis=0)        # (2H, D)
    return jnp.asarray(w.T, dtype=compute_dtype)      # (D, 2H)


# ---------------------------------------------------------------------------
# Forward
# ---------------------------------------------------------------------------

def disentangle_net(z, w_fused, H, *, compute_dtype=jnp.bfloat16,
                    tile_b=None, tile_h=None,
                    use_xla_fastpath=True,
                    xla_fastpath_flops=4 * 1024 * 1024):
    """Pallas forward. Returns (a_vec, s_vec) = (z @ Wa^T, z @ Ws^T)."""
    B, D = z.shape
    two_h = w_fused.shape[1]
    assert w_fused.shape == (D, 2 * H), "w_fused must be (D, 2H)"

    out_dtype = z.dtype
    zc = z.astype(compute_dtype)
    wc = w_fused.astype(compute_dtype)  # no-op when prepare_fused_weight used

    # Tiny-problem fast path: the pallas_call / grid-step overhead dominates
    # below a few MFLOPs; let XLA handle it with a single fused dot.
    if use_xla_fastpath and 2 * B * D * two_h < xla_fastpath_flops:
        fused = jnp.dot(zc, wc,
                        preferred_element_type=jnp.float32).astype(out_dtype)
        return fused[:, :H], fused[:, H:]

    gen, vmem_cap = _tpu_info()
    w_bytes = jnp.dtype(compute_dtype).itemsize
    o_bytes = jnp.dtype(out_dtype).itemsize

    auto_tb, auto_th = _choose_tiles(B, D, two_h, gen=gen, vmem_cap=vmem_cap,
                                     w_bytes=w_bytes, o_bytes=o_bytes)
    if tile_b is None:
        tile_b = auto_tb
    if tile_h is None:
        tile_h = auto_th
    assert two_h % tile_h == 0 and tile_b % 8 == 0

    nb = pl.cdiv(B, tile_b)
    nh = two_h // tile_h
    b_pad = nb * tile_b
    if b_pad != B:                       # ragged batch -> zero-pad, slice after
        zc = jnp.pad(zc, ((0, b_pad - B), (0, 0)))

    # VMEM: double-buffered z tile + weight slice + output tile, with headroom,
    # capped at 75% of the physical per-core VMEM (48 MiB on v7x, 96 on v5e/v6e).
    vmem_needed = 2 * ((tile_b * D + D * tile_h) * w_bytes
                       + tile_b * tile_h * o_bytes)
    vmem_limit = int(min(int(0.75 * vmem_cap),
                         max(32 << 20, vmem_needed + (8 << 20))))

    # ---- Path 1: H is a multiple of 128 and the full weight is resident:
    # write the two outputs directly from the kernel (no post-slice copies).
    if H % 128 == 0 and nh == 1:
        cost = pl.CostEstimate(
            flops=2 * b_pad * D * two_h,
            transcendentals=0,
            bytes_accessed=(b_pad * D * w_bytes + D * two_h * w_bytes
                            + 2 * b_pad * H * o_bytes),
        )
        a, s = pl.pallas_call(
            _disentangle_split_kernel,
            out_shape=(jax.ShapeDtypeStruct((b_pad, H), out_dtype),
                       jax.ShapeDtypeStruct((b_pad, H), out_dtype)),
            grid_spec=pltpu.PrefetchScalarGridSpec(
                num_scalar_prefetch=0,
                grid=(nb,),
                in_specs=[
                    pl.BlockSpec((tile_b, D), lambda i: (i, 0)),   # z batch tile
                    pl.BlockSpec((D, two_h), lambda i: (0, 0)),    # full fused W
                ],
                out_specs=[
                    pl.BlockSpec((tile_b, H), lambda i: (i, 0)),   # a_vec
                    pl.BlockSpec((tile_b, H), lambda i: (i, 0)),   # s_vec
                ],
            ),
            compiler_params=pltpu.CompilerParams(
                dimension_semantics=("parallel",),
                vmem_limit_bytes=vmem_limit,
            ),
            cost_estimate=cost,
        )(zc, wc)
        return a[:B], s[:B]

    # ---- Path 2: fused (B, 2H) output (lane-dense when H < 128, e.g. H=64
    # -> 128-wide unmasked stores). Column axis is the OUTER grid axis so each
    # weight slice is DMA'd from HBM exactly once; z is re-fetched nh times.
    cost = pl.CostEstimate(
        flops=2 * b_pad * D * two_h,
        transcendentals=0,
        bytes_accessed=(nh * b_pad * D * w_bytes + D * two_h * w_bytes
                        + b_pad * two_h * o_bytes),
    )
    fused = pl.pallas_call(
        _disentangle_fused_kernel,
        out_shape=jax.ShapeDtypeStruct((b_pad, two_h), out_dtype),
        grid_spec=pltpu.PrefetchScalarGridSpec(
            num_scalar_prefetch=0,
            grid=(nh, nb),                                     # batch innermost
            in_specs=[
                pl.BlockSpec((tile_b, D), lambda j, i: (i, 0)),  # z batch tile
                pl.BlockSpec((D, tile_h), lambda j, i: (0, j)),  # fused W slice
            ],
            out_specs=pl.BlockSpec((tile_b, tile_h), lambda j, i: (i, j)),
        ),
        compiler_params=pltpu.CompilerParams(
            dimension_semantics=("parallel", "parallel"),
            vmem_limit_bytes=vmem_limit,
        ),
        cost_estimate=cost,
    )(zc, wc)
    fused = fused[:B]
    return fused[:, :H], fused[:, H:]


# ---------------------------------------------------------------------------
# Self-test
# ---------------------------------------------------------------------------

if __name__ == "__main__":
    key = jax.random.PRNGKey(0)

    # ---- Test 1: H=64 (fused-output kernel, 128-lane store), B=16, D=32 ----
    B, D, H = 16, 32, 64
    kz, ka, ks, key = jax.random.split(key, 4)
    z = jax.random.normal(kz, (B, D), dtype=jnp.float32)
    bound = 1.0 / (D ** 0.5)
    w_act = jax.random.uniform(ka, (H, D), jnp.float32, -bound, bound)
    w_sp = jax.random.uniform(ks, (H, D), jnp.float32, -bound, bound)

    a_ref = z @ w_act.T
    s_ref = z @ w_sp.T

    # bf16-MXU Pallas path (fast path disabled so the kernel actually runs).
    w_fused_bf16 = prepare_fused_weight(w_act, w_sp, jnp.bfloat16)
    a_vec, s_vec = disentangle_net(z, w_fused_bf16, H, use_xla_fastpath=False)
    jax.block_until_ready((a_vec, s_vec))
    assert a_vec.shape == (B, H) and s_vec.shape == (B, H)
    assert jnp.allclose(a_vec, a_ref, atol=5e-2, rtol=5e-2)
    assert jnp.allclose(s_vec, s_ref, atol=5e-2, rtol=5e-2)

    # f32 precision path through the same kernel (tight tolerance).
    w_fused_f32 = prepare_fused_weight(w_act, w_sp, jnp.float32)
    a32, s32 = disentangle_net(z, w_fused_f32, H, compute_dtype=jnp.float32,
                               use_xla_fastpath=False)
    jax.block_until_ready((a32, s32))
    assert jnp.allclose(a32, a_ref, atol=1e-4, rtol=1e-4)
    assert jnp.allclose(s32, s_ref, atol=1e-4, rtol=1e-4)

    # Tiny-shape XLA fast path (default behaviour at this FLOP count).
    a_fast, s_fast = disentangle_net(z, w_fused_bf16, H)
    jax.block_until_ready((a_fast, s_fast))
    assert jnp.allclose(a_fast, a_ref, atol=5e-2, rtol=5e-2)
    assert jnp.allclose(s_fast, s_ref, atol=5e-2, rtol=5e-2)

    # ---- Test 2: H=128 (split-output kernel, no post-kernel slice copies) ----
    B2, D2, H2 = 32, 64, 128
    kz2, ka2, ks2, key = jax.random.split(key, 4)
    z2 = jax.random.normal(kz2, (B2, D2), dtype=jnp.float32)
    bound2 = 1.0 / (D2 ** 0.5)
    w_act2 = jax.random.uniform(ka2, (H2, D2), jnp.float32, -bound2, bound2)
    w_sp2 = jax.random.uniform(ks2, (H2, D2), jnp.float32, -bound2, bound2)
    w_fused2 = prepare_fused_weight(w_act2, w_sp2, jnp.bfloat16)
    a2, s2 = disentangle_net(z2, w_fused2, H2, use_xla_fastpath=False)
    jax.block_until_ready((a2, s2))
    assert a2.shape == (B2, H2) and s2.shape == (B2, H2)
    assert jnp.allclose(a2, z2 @ w_act2.T, atol=5e-2, rtol=5e-2)
    assert jnp.allclose(s2, z2 @ w_sp2.T, atol=5e-2, rtol=5e-2)

    print("KERNEL_OK")
</pallas_src>

<mosaic_0001>
module attributes {stable_mosaic.version = 11 : i64} {
  func.func @_disentangle_fused_kernel(%arg0: i32, %arg1: i32, %arg2: memref<16x32xbf16, #tpu.memory_space<vmem>>, %arg3: memref<32x128xbf16, #tpu.memory_space<vmem>>, %arg4: memref<16x128xf32, #tpu.memory_space<vmem>>) attributes {dimension_semantics = [#tpu.dimension_semantics<parallel>, #tpu.dimension_semantics<parallel>], iteration_bounds = array<i64: 1, 1>, scalar_prefetch = 0 : i64, scratch_operands = 0 : i64, tpu.core_type = #tpu.core_type<tc>, window_params = [{transform_indices = @transform_0, window_bounds = array<i64: 16, 32>}, {transform_indices = @transform_1, window_bounds = array<i64: 32, 128>}, {transform_indices = @transform_2, window_bounds = array<i64: 16, 128>}]} {
    %c0 = arith.constant 0 : index
    %c0_0 = arith.constant 0 : index
    %0 = vector.load %arg2[%c0, %c0_0] : memref<16x32xbf16, #tpu.memory_space<vmem>>, vector<16x32xbf16>
    %c0_1 = arith.constant 0 : index
    %c0_2 = arith.constant 0 : index
    %1 = vector.load %arg3[%c0_1, %c0_2] : memref<32x128xbf16, #tpu.memory_space<vmem>>, vector<32x128xbf16>
    %cst = arith.constant dense<0.000000e+00> : vector<16x128xf32>
    %2 = tpu.matmul %0, %1, %cst {dimension_numbers = #tpu.dot_dimension_numbers<[1], [0], [0], [1], [0, 0, 1, 1], [], []>} : vector<16x32xbf16>, vector<32x128xbf16>, vector<16x128xf32> -> vector<16x128xf32>
    %c0_3 = arith.constant 0 : index
    %c0_4 = arith.constant 0 : index
    %3 = vector.load %arg4[%c0_3, %c0_4] : memref<16x128xf32, #tpu.memory_space<vmem>>, vector<16x128xf32>
    tpu.vector_store %arg4[%c0_3, %c0_4], %2 {strides = array<i32>} : memref<16x128xf32, #tpu.memory_space<vmem>>, vector<16x128xf32>,
    return
  }
  func.func @transform_0(%arg0: i32, %arg1: i32) -> (i32, i32) {
    %c0_i32 = arith.constant 0 : i32
    %c0_i32_0 = arith.constant 0 : i32
    return %arg1, %c0_i32 : i32, i32
  }
  func.func @transform_1(%arg0: i32, %arg1: i32) -> (i32, i32) {
    %c0_i32 = arith.constant 0 : i32
    %c0_i32_0 = arith.constant 0 : i32
    return %c0_i32, %arg0 : i32, i32
  }
  func.func @transform_2(%arg0: i32, %arg1: i32) -> (i32, i32) {
    %c0_i32 = arith.constant 0 : i32
    return %arg1, %arg0 : i32, i32
  }
}

</mosaic_0001>

<bundles_post_ra>
// kernel: tpu_custom_call.1
= control target key start
LH: loop header
LB: loop body
LE: loop exit
PB: predicated region body
PF: predicated region fallthrough
CT: control target
= control target key end

     0   :  { %7 = vsyncpa [#allocation3], 0  ;;  %s288_s0 = inlined_call_operand.hbm [shape: bf16[16,32], index: 0, kind: input, shape index: {}]   ;;  %s289_s1 = inlined_call_operand.hbm [shape: bf16[32,128], index: 1, kind: input, shape index: {}]   ;;  %s290_s2 = inlined_call_operand.hbm [shape: f32[16,128], index: 2, kind: output, shape index: {}]  }
   0x1   :  { %8 = vsyncpa [#allocation6], 0 }
   0x2   :  { %9 = vsyncpa [#allocation4], 0  ;;  %s228_s9 = smov [#allocation2]   ;;  %s156_s13 = scalar_lea.hbm %s288_s0, 128 }
   0x3   :  { %s15_s10 = sshll.u32 %s228_s9, 4  ;;  %p157_p0 = scmp.ne.s32.totalorder %s288_s0, %s156_s13  ;;  %s16_s10 = int_to_ptr.vmem [resolvable:$true] %s15_s10 }
   0x4   :  { %p160_p1 = scmp.lt.u32.totalorder %s156_s13, %s288_s0 }
   0x6   :  { %p162_p2 = pnand %p160_p1, %p157_p0 }
   0x8   :  { %165 = shalt.err (!%p162_p2)
}
   0x9   :  { %s166_s18 = scalar_lea.vmem %s16_s10, 128  ;;  %p171_p4 = scmp.lt.s32.totalorder %s16_s10, %s16_s10 }
   0xa   :  { %p167_p3 = scmp.ne.s32.totalorder %s16_s10, %s166_s18  ;;  %p172_p5 = scmp.lt.s32.totalorder %s166_s18, %s166_s18 }
   0xc   :  { %p173_p6 = por %p172_p5, %p171_p4 }
   0xe   :  { %p174_p7 = pnand %p173_p6, %p167_p3 }
  0x10   :  { %177 = shalt.err (!%p174_p7)
}
  0x11   :  { %s229_s19 = smov 64   ;;  %s230_s20 = smov 4  }
  0x12   :  { %21 = dma.hbm_to_vmem [thread:$0]  %s288_s0, 128, %s16_s10, [#allocation3], %s229_s19, %s229_s19, %s230_s20  }
  0x13   :  { %s231_s23 = smov [#allocation5]   ;;  %s178_s27 = scalar_lea.hbm %s289_s1, 256 }
  0x14   :  { %s27_s24 = sshll.u32 %s231_s23, 4  ;;  %p179_p8 = scmp.ne.s32.totalorder %s289_s1, %s178_s27  ;;  %s28_s24 = int_to_ptr.vmem [resolvable:$true] %s27_s24 }
  0x15   :  { %p182_p9 = scmp.lt.u32.totalorder %s178_s27, %s289_s1 }
  0x17   :  { %p184_p10 = pnand %p182_p9, %p179_p8 }
  0x19   :  { %187 = shalt.err (!%p184_p10)
}
  0x1a   :  { %s188_s4 = scalar_lea.vmem %s28_s24, 256  ;;  %p193_p12 = scmp.lt.s32.totalorder %s28_s24, %s28_s24 }
  0x1b   :  { %p189_p11 = scmp.ne.s32.totalorder %s28_s24, %s188_s4  ;;  %p194_p13 = scmp.lt.s32.totalorder %s188_s4, %s188_s4 }
  0x1d   :  { %p195_p0 = por %p194_p13, %p193_p12 }
  0x1f   :  { %p196_p1 = pnand %p195_p0, %p189_p11 }
  0x21   :  { %199 = shalt.err (!%p196_p1)
}
  0x22   :  { %33 = dma.hbm_to_vmem [thread:$0]  %s289_s1, 256, %s28_s24, [#allocation6], %s229_s19, %s229_s19, %s230_s20  }
  0x23   :  { %222 = dma.done.wait [#allocation3], 128  }
  0x24   :  { %223 = vsyncadd [#allocation3], 4294967168 }
  0x25   :  { %224 = dma.done.wait [#allocation6], 256  }
  0x26   :  { %225 = vsyncadd [#allocation6], 4294967040  ;;  %v232_v0 = vmov 0.0   ;;  %vm233_vm0 = vmmov 0   ;;  %v153_v1 = vld [vmem:[#allocation5] sm:$0xff]   ;;  %v154_v2 = vld [vmem:[#allocation5 + $0x8] sm:$0xff]  }
  0x27   :  { %136 = vmatprep.subr.bf16.mxu0 %v232_v0  ;;  %140 = vmatprep.mubr.msk.bf16.mxu0 %vm233_vm0, %v232_v0  ;;  %v155_v3 = vld [vmem:[#allocation2] sm:$0xff]   ;;  %vm64_vm1 = vcmask 261120   ;;  %s234_s6 = smov [#allocation7]  }
  0x28   :  { %137 = vmatpush3.bf16.msra.mxu0 %v153_v1  ;;  %s116_s7 = sshll.u32 %s234_s6, 4  ;;  %s117_s7 = int_to_ptr.vmem [resolvable:$true] %s116_s7 }
  0x29   :  { %138 = vmatprep.subr.bf16.mxu0 %v232_v0  ;;  %s200_s1 = scalar_lea.vmem %s117_s7, 256  ;;  %p205_p3 = scmp.lt.s32.totalorder %s117_s7, %s117_s7 }
  0x2a   :  { %p201_p2 = scmp.ne.s32.totalorder %s117_s7, %s200_s1  ;;  %p206_p4 = scmp.lt.s32.totalorder %s200_s1, %s200_s1 }
  0x2c   :  { %139 = vmatpush3.bf16.msra.mxu0 %v154_v2  ;;  %p207_p5 = por %p206_p4, %p205_p3 }
  0x2e   :  { %p208_p6 = pnand %p207_p5, %p201_p2 }
  0x2f   :  { %141 = vmatmul.mubr.msk.bf16.vlgmr.msra.gmra.mrb[0].mxu0 %vm64_vm1, %v155_v3 }
 0x102   :  { %v102_v4 = vpop.f32.mrb[0].mxu0 }
 0x103   :  { %109 = vst [vmem:[#allocation7] sm:$0xff] %v102_v4  ;;  %v142_v5 = vpop.f32.mrb[1].mxu0 }
 0x104   :  { %v105_v6 = vpop.f32.mrb[2].mxu0 }
 0x105   :  { %110 = vst [vmem:[#allocation7 + $0x8] sm:$0xff] %v105_v6  ;;  %v143_v7 = vpop.f32.mrb[3].mxu0 }
 0x106   :  { %211 = shalt.err (!%p208_p6)
}
 0x107   :  { %s212_s10 = scalar_lea.hbm %s290_s2, 256 }
 0x108   :  { %p213_p7 = scmp.ne.s32.totalorder %s290_s2, %s212_s10  ;;  %p216_p8 = scmp.lt.u32.totalorder %s212_s10, %s290_s2 }
 0x10a   :  { %p218_p9 = pnand %p216_p8, %p213_p7 }
 0x10c   :  { %221 = shalt.err (!%p218_p9)
}
 0x10d   :  { %s235_s15 = smov 128   ;;  %s236_s16 = smov 8  }
 0x10e   :  { %122 = dma.vmem_to_hbm [thread:$0]  %s117_s7, 256, %s290_s2, [#allocation4], %s235_s15, %s235_s15, %s236_s16  }
 0x10f   :  { %226 = dma.done.wait [#allocation4], 256  }
 0x110   :  { %227 = vsyncadd [#allocation4], 4294967040 }
 0x111   :  { %126 = vsyncpa [#allocation3], 1 }
 0x112   :  { %127 = vsyncpa [#allocation6], 1 }
 0x113   :  { %128 = vsyncpa [#allocation4], 1 }

</bundles_post_ra>
